<compile_context>
chip_gen: v5e
topology: v5e:2x2
jax: 0.10.0
libtpu: 0.0.40
codegen_flags: <defaults>
</compile_context>

<pallas_src>
import functools

import jax
import jax.numpy as jnp
from jax.experimental import pallas as pl
from jax.experimental.pallas import tpu as pltpu

HIDDEN1 = 128
HIDDEN2 = 64
LANE = 128
SUBLANE = 8


def _round_up(x, m):
    return (x + m - 1) // m * m


def _qnet_kernel(x_ref, w1_ref, b1_ref, w2_ref, b2_ref, w3_ref, b3_ref, out_ref):
    # fc1 + relu  (MXU matmul, f32 accumulate; bias/ReLU in f32 on the VPU)
    x = x_ref[...]
    h1 = jnp.dot(x, w1_ref[...], preferred_element_type=jnp.float32) + b1_ref[...]
    h1 = jnp.maximum(h1, 0.0).astype(w2_ref.dtype)
    # fc2 + relu
    h2 = jnp.dot(h1, w2_ref[...], preferred_element_type=jnp.float32) + b2_ref[...]
    h2 = jnp.maximum(h2, 0.0).astype(w3_ref.dtype)
    # fc3 (no activation) -> lane-dense (TB, 128) unmasked store
    out = jnp.dot(h2, w3_ref[...], preferred_element_type=jnp.float32) + b3_ref[...]
    out_ref[...] = out.astype(out_ref.dtype)


@functools.partial(jax.jit, static_argnames=("compute_dtype", "batch_tile"))
def qnetwork_forward(state, params, *, compute_dtype=jnp.float32, batch_tile=512):
    """state: [B, state_size] float32. params: dict of w1,b1,w2,b2,w3,b3 ([in,out] weights)."""
    w1, b1 = params["w1"], params["b1"]
    w2, b2 = params["w2"], params["b2"]
    w3, b3 = params["w3"], params["b3"]

    B, state_size = state.shape
    h1 = w1.shape[1]                      # 128
    h2 = w2.shape[1]                      # 64
    action_size = w3.shape[1]
    d_out = _round_up(action_size, LANE)  # e.g. 8 -> 128 (unmasked output stores)

    # Batch tile: multiple of 8, capped at batch_tile; batch padded to a tile multiple.
    tb = min(_round_up(batch_tile, SUBLANE), _round_up(B, SUBLANE))
    b_pad = _round_up(B, tb)

    f32 = jnp.float32
    x_p = state.astype(compute_dtype)
    if b_pad != B:  # zero rows are exact: 0*w=0, relu(bias) rows are sliced off anyway
        x_p = jnp.pad(x_p, ((0, b_pad - B), (0, 0)))

    w1_c = w1.astype(compute_dtype)
    b1_c = b1.reshape(1, h1).astype(f32)
    w2_c = w2.astype(compute_dtype)
    b2_c = b2.reshape(1, h2).astype(f32)
    # Only the final output dim is zero-padded; padded columns are exact and sliced off.
    w3_p = jnp.zeros((h2, d_out), compute_dtype).at[:, :action_size].set(
        w3.astype(compute_dtype))
    b3_p = jnp.zeros((1, d_out), f32).at[:, :action_size].set(
        b3.reshape(1, -1).astype(f32))

    grid = (b_pad // tb,)
    resident = lambda a: pl.BlockSpec(a.shape, lambda i, _n=a.ndim: (0,) * _n)  # DMA'd once

    out_padded = pl.pallas_call(
        _qnet_kernel,
        out_shape=jax.ShapeDtypeStruct((b_pad, d_out), jnp.float32),
        grid=grid,
        in_specs=[
            pl.BlockSpec((tb, state_size), lambda i: (i, 0)),  # batch-tiled, pipelined
            resident(w1_c), resident(b1_c),
            resident(w2_c), resident(b2_c),
            resident(w3_p), resident(b3_p),
        ],
        out_specs=pl.BlockSpec((tb, d_out), lambda i: (i, 0)),
        compiler_params=pltpu.CompilerParams(
            dimension_semantics=("parallel",),  # v7x: shard batch tiles over 2 TCs
            vmem_limit_bytes=32 << 20,          # tiny working set; safe on v7x 64 MiB VMEM
        ),
    )(x_p, w1_c, b1_c, w2_c, b2_c, w3_p, b3_p)

    # Slice off batch / action padding BEFORE any downstream argmax over actions.
    return out_padded[:B, :action_size]


def init_params(key, state_size, action_size):
    """Deterministic init mirroring nn.Linear shapes (stored transposed as [in, out])."""
    ks = jax.random.split(key, 6)

    def linear(kw, kb, fan_in, fan_out):
        bound = 1.0 / jnp.sqrt(fan_in)
        w = jax.random.uniform(kw, (fan_in, fan_out), jnp.float32, -bound, bound)
        b = jax.random.uniform(kb, (1, fan_out), jnp.float32, -bound, bound)
        return w, b

    w1, b1 = linear(ks[0], ks[1], state_size, HIDDEN1)
    w2, b2 = linear(ks[2], ks[3], HIDDEN1, HIDDEN2)
    w3, b3 = linear(ks[4], ks[5], HIDDEN2, action_size)
    return {"w1": w1, "b1": b1, "w2": w2, "b2": b2, "w3": w3, "b3": b3}


def _ref_forward(state, params):
    x = jnp.maximum(state @ params["w1"] + params["b1"], 0.0)
    x = jnp.maximum(x @ params["w2"] + params["b2"], 0.0)
    return x @ params["w3"] + params["b3"]


if __name__ == "__main__":
    key = jax.random.PRNGKey(0)
    k_param, k_x1, k_x2 = jax.random.split(key, 3)

    state_size = 32
    action_size = 8  # Q-values for 8 discrete actions
    params = init_params(k_param, state_size, action_size)

    # --- small batch, single tile, f32 (exact) ---
    batch = 8
    state = jax.random.normal(k_x1, (batch, state_size), jnp.float32)
    ref = _ref_forward(state, params)
    out = jax.block_until_ready(qnetwork_forward(state, params))
    assert out.shape == (batch, action_size)
    assert jnp.allclose(out, ref, atol=3e-5, rtol=3e-5)

    # --- larger ragged batch, multiple tiles (exercises grid pipelining + batch pad) ---
    batch2 = 300
    state2 = jax.random.normal(k_x2, (batch2, state_size), jnp.float32)
    ref2 = _ref_forward(state2, params)
    out2 = jax.block_until_ready(qnetwork_forward(state2, params, batch_tile=128))
    assert out2.shape == (batch2, action_size)
    assert jnp.allclose(out2, ref2, atol=3e-5, rtol=3e-5)

    # --- bf16 weight/activation fast-MXU path (f32 accumulation), loose check ---
    out_bf16 = jax.block_until_ready(
        qnetwork_forward(state, params, compute_dtype=jnp.bfloat16))
    assert out_bf16.shape == (batch, action_size)
    assert float(jnp.max(jnp.abs(out_bf16 - ref))) < 0.25

    print("KERNEL_OK")
</pallas_src>

<mosaic_0001>
module attributes {stable_mosaic.version = 11 : i64} {
  func.func @_qnet_kernel(%arg0: i32, %arg1: memref<8x32xf32, #tpu.memory_space<vmem>>, %arg2: memref<32x128xf32, #tpu.memory_space<vmem>>, %arg3: memref<1x128xf32, #tpu.memory_space<vmem>>, %arg4: memref<128x64xf32, #tpu.memory_space<vmem>>, %arg5: memref<1x64xf32, #tpu.memory_space<vmem>>, %arg6: memref<64x128xf32, #tpu.memory_space<vmem>>, %arg7: memref<1x128xf32, #tpu.memory_space<vmem>>, %arg8: memref<8x128xf32, #tpu.memory_space<vmem>>) attributes {dimension_semantics = [#tpu.dimension_semantics<parallel>], iteration_bounds = array<i64: 1>, scalar_prefetch = 0 : i64, scratch_operands = 0 : i64, tpu.core_type = #tpu.core_type<tc>, window_params = [{transform_indices = @transform_0, window_bounds = array<i64: 8, 32>}, {pipeline_mode = #tpu.pipeline_mode<synchronous>, transform_indices = @transform_1, window_bounds = array<i64: 32, 128>}, {pipeline_mode = #tpu.pipeline_mode<synchronous>, transform_indices = @transform_2, window_bounds = array<i64: 1, 128>}, {pipeline_mode = #tpu.pipeline_mode<synchronous>, transform_indices = @transform_3, window_bounds = array<i64: 128, 64>}, {pipeline_mode = #tpu.pipeline_mode<synchronous>, transform_indices = @transform_4, window_bounds = array<i64: 1, 64>}, {pipeline_mode = #tpu.pipeline_mode<synchronous>, transform_indices = @transform_5, window_bounds = array<i64: 64, 128>}, {pipeline_mode = #tpu.pipeline_mode<synchronous>, transform_indices = @transform_6, window_bounds = array<i64: 1, 128>}, {transform_indices = @transform_7, window_bounds = array<i64: 8, 128>}]} {
    %c0 = arith.constant 0 : index
    %c0_0 = arith.constant 0 : index
    %0 = vector.load %arg1[%c0, %c0_0] : memref<8x32xf32, #tpu.memory_space<vmem>>, vector<8x32xf32>
    %c0_1 = arith.constant 0 : index
    %c0_2 = arith.constant 0 : index
    %1 = vector.load %arg2[%c0_1, %c0_2] : memref<32x128xf32, #tpu.memory_space<vmem>>, vector<32x128xf32>
    %cst = arith.constant dense<0.000000e+00> : vector<8x128xf32>
    %2 = tpu.matmul %0, %1, %cst {dimension_numbers = #tpu.dot_dimension_numbers<[1], [0], [0], [1], [0, 0, 1, 1], [], []>} : vector<8x32xf32>, vector<32x128xf32>, vector<8x128xf32> -> vector<8x128xf32>
    %c0_3 = arith.constant 0 : index
    %c0_4 = arith.constant 0 : index
    %3 = vector.load %arg3[%c0_3, %c0_4] : memref<1x128xf32, #tpu.memory_space<vmem>>, vector<1x128xf32>
    %4 = vector.broadcast %3 : vector<1x128xf32> to vector<8x128xf32>
    %5 = arith.addf %2, %4 : vector<8x128xf32>
    %cst_5 = arith.constant 0.000000e+00 : f32
    %6 = vector.broadcast %cst_5 : f32 to vector<8x128xf32>
    %7 = arith.maximumf %5, %6 : vector<8x128xf32>
    %c0_6 = arith.constant 0 : index
    %c0_7 = arith.constant 0 : index
    %8 = vector.load %arg4[%c0_6, %c0_7] : memref<128x64xf32, #tpu.memory_space<vmem>>, vector<128x64xf32>
    %cst_8 = arith.constant dense<0.000000e+00> : vector<8x64xf32>
    %9 = tpu.matmul %7, %8, %cst_8 {dimension_numbers = #tpu.dot_dimension_numbers<[1], [0], [0], [1], [0, 0, 1, 1], [], []>} : vector<8x128xf32>, vector<128x64xf32>, vector<8x64xf32> -> vector<8x64xf32>
    %c0_9 = arith.constant 0 : index
    %c0_10 = arith.constant 0 : index
    %10 = vector.load %arg5[%c0_9, %c0_10] : memref<1x64xf32, #tpu.memory_space<vmem>>, vector<1x64xf32>
    %11 = vector.broadcast %10 : vector<1x64xf32> to vector<8x64xf32>
    %12 = arith.addf %9, %11 : vector<8x64xf32>
    %cst_11 = arith.constant 0.000000e+00 : f32
    %13 = vector.broadcast %cst_11 : f32 to vector<8x64xf32>
    %14 = arith.maximumf %12, %13 : vector<8x64xf32>
    %c0_12 = arith.constant 0 : index
    %c0_13 = arith.constant 0 : index
    %15 = vector.load %arg6[%c0_12, %c0_13] : memref<64x128xf32, #tpu.memory_space<vmem>>, vector<64x128xf32>
    %cst_14 = arith.constant dense<0.000000e+00> : vector<8x128xf32>
    %16 = tpu.matmul %14, %15, %cst_14 {dimension_numbers = #tpu.dot_dimension_numbers<[1], [0], [0], [1], [0, 0, 1, 1], [], []>} : vector<8x64xf32>, vector<64x128xf32>, vector<8x128xf32> -> vector<8x128xf32>
    %c0_15 = arith.constant 0 : index
    %c0_16 = arith.constant 0 : index
    %17 = vector.load %arg7[%c0_15, %c0_16] : memref<1x128xf32, #tpu.memory_space<vmem>>, vector<1x128xf32>
    %18 = vector.broadcast %17 : vector<1x128xf32> to vector<8x128xf32>
    %19 = arith.addf %16, %18 : vector<8x128xf32>
    %c0_17 = arith.constant 0 : index
    %c0_18 = arith.constant 0 : index
    %20 = vector.load %arg8[%c0_17, %c0_18] : memref<8x128xf32, #tpu.memory_space<vmem>>, vector<8x128xf32>
    tpu.vector_store %arg8[%c0_17, %c0_18], %19 {strides = array<i32>} : memref<8x128xf32, #tpu.memory_space<vmem>>, vector<8x128xf32>,
    return
  }
  func.func @transform_0(%arg0: i32) -> (i32, i32) {
    %c0_i32 = arith.constant 0 : i32
    %c0_i32_0 = arith.constant 0 : i32
    return %arg0, %c0_i32 : i32, i32
  }
  func.func @transform_1(%arg0: i32) -> (i32, i32) {
    %c0_i32 = arith.constant 0 : i32
    %c0_i32_0 = arith.constant 0 : i32
    %c0_i32_1 = arith.constant 0 : i32
    return %c0_i32, %c0_i32_0 : i32, i32
  }
  func.func @transform_2(%arg0: i32) -> (i32, i32) {
    %c0_i32 = arith.constant 0 : i32
    %c0_i32_0 = arith.constant 0 : i32
    %c0_i32_1 = arith.constant 0 : i32
    return %c0_i32, %c0_i32_0 : i32, i32
  }
  func.func @transform_3(%arg0: i32) -> (i32, i32) {
    %c0_i32 = arith.constant 0 : i32
    %c0_i32_0 = arith.constant 0 : i32
    %c0_i32_1 = arith.constant 0 : i32
    return %c0_i32, %c0_i32_0 : i32, i32
  }
  func.func @transform_4(%arg0: i32) -> (i32, i32) {
    %c0_i32 = arith.constant 0 : i32
    %c0_i32_0 = arith.constant 0 : i32
    %c0_i32_1 = arith.constant 0 : i32
    return %c0_i32, %c0_i32_0 : i32, i32
  }
  func.func @transform_5(%arg0: i32) -> (i32, i32) {
    %c0_i32 = arith.constant 0 : i32
    %c0_i32_0 = arith.constant 0 : i32
    %c0_i32_1 = arith.constant 0 : i32
    return %c0_i32, %c0_i32_0 : i32, i32
  }
  func.func @transform_6(%arg0: i32) -> (i32, i32) {
    %c0_i32 = arith.constant 0 : i32
    %c0_i32_0 = arith.constant 0 : i32
    %c0_i32_1 = arith.constant 0 : i32
    return %c0_i32, %c0_i32_0 : i32, i32
  }
  func.func @transform_7(%arg0: i32) -> (i32, i32) {
    %c0_i32 = arith.constant 0 : i32
    %c0_i32_0 = arith.constant 0 : i32
    return %arg0, %c0_i32 : i32, i32
  }
}

</mosaic_0001>

<bundles_post_ra>
// kernel: qnetwork_forward.1
= control target key start
LH: loop header
LB: loop body
LE: loop exit
PB: predicated region body
PF: predicated region fallthrough
CT: control target
= control target key end

     0   :  { %vm36_vm0 = vcmask 261120   ;;  %s327_s0 = inlined_call_operand.vmem [shape: f32[8,32], index: 0, kind: input, shape index: {}]   ;;  %s328_s1 = inlined_call_operand.vmem [shape: f32[32,128], index: 1, kind: input, shape index: {}]   ;;  %s329_s2 = inlined_call_operand.vmem [shape: f32[1,128], index: 2, kind: input, shape index: {}]   ;;  %s330_s3 = inlined_call_operand.vmem [shape: f32[128,64], index: 3, kind: input, shape index: {}]   ;;  %s331_s4 = inlined_call_operand.vmem [shape: f32[1,64], index: 4, kind: input, shape index: {}]   ;;  %s332_s5 = inlined_call_operand.vmem [shape: f32[64,128], index: 5, kind: input, shape index: {}]   ;;  %s333_s6 = inlined_call_operand.vmem [shape: f32[1,128], index: 6, kind: input, shape index: {}]   ;;  %s334_s7 = inlined_call_operand.hbm [shape: f32[8,128], index: 7, kind: output, shape index: {}]  }
   0x1   :  { %v31_v0 = vld [vmem:[%s328_s1 + $0x18] sm:$0xff]  ;;  %v30_v1 = vld [vmem:[%s328_s1 + $0x10] sm:$0xff]  ;;  %v29_v3 = vld [vmem:[%s328_s1 + $0x8] sm:$0xff] }
   0x2   :  { %52 = vmatpush.msra.mxu0 %v31_v0  ;;  %v76_v2 = vld [vmem:[%s330_s3 + $0x78] sm:$0xff]  ;;  %v75_v4 = vld [vmem:[%s330_s3 + $0x70] sm:$0xff]  ;;  %v74_v5 = vld [vmem:[%s330_s3 + $0x68] sm:$0xff] }
   0x3   :  { %81 = vmatpush.msra.mxu1 %v76_v2  ;;  %v28_v6 = vld [vmem:[%s328_s1] sm:$0xff]  ;;  %v72_v9 = vld [vmem:[%s330_s3 + $0x58] sm:$0xff] }
   0x4   :  { %53 = vmatpush.msra.mxu0 %v30_v1  ;;  %v27_v7 = vld [vmem:[%s327_s0] sm:$0xff] }
   0x5   :  { %82 = vmatpush.msra.mxu1 %v75_v4  ;;  %v73_v8 = vld [vmem:[%s330_s3 + $0x60] sm:$0xff] }
   0x6   :  { %54 = vmatpush.msra.mxu0 %v29_v3 }
   0x7   :  { %83 = vmatpush.msra.mxu1 %v74_v5 }
   0x8   :  { %55 = vmatpush.msra.mxu0 %v28_v6 }
   0x9   :  { %12 = vsyncpa [#allocation3], 0  ;;  %155 = vmatmul.msk.f32.vlgmr.msra.gmra.mxu0 %vm36_vm0, %v27_v7  ;;  %84 = vmatpush.msra.mxu1 %v73_v8  ;;  %v71_v10 = vld [vmem:[%s330_s3 + $0x50] sm:$0xff]  ;;  %v70_v11 = vld [vmem:[%s330_s3 + $0x48] sm:$0xff]  ;;  %vm114_vm1 = vcmask 523264   ;;  %s187_s13 = smov [#allocation2]  }
   0xa   :  { %v69_v12 = vld [vmem:[%s330_s3 + $0x40] sm:$0xff]  ;;  %v68_v13 = vld [vmem:[%s330_s3 + $0x38] sm:$0xff]  ;;  %v67_v14 = vld [vmem:[%s330_s3 + $0x30] sm:$0xff]  ;;  %s144_s14 = sshll.u32 %s187_s13, 4  ;;  %s145_s14 = int_to_ptr.vmem [resolvable:$true] %s144_s14 }
   0xb   :  { %85 = vmatpush.msra.mxu1 %v72_v9  ;;  %v66_v15 = vld [vmem:[%s330_s3 + $0x28] sm:$0xff]  ;;  %v65_v16 = vld [vmem:[%s330_s3 + $0x20] sm:$0xff]  ;;  %v64_v17 = vld [vmem:[%s330_s3 + $0x18] sm:$0xff] }
   0xc   :  { %v63_v18 = vld [vmem:[%s330_s3 + $0x10] sm:$0xff]  ;;  %v62_v19 = vld [vmem:[%s330_s3 + $0x8] sm:$0xff]  ;;  %v61_v20 = vld [vmem:[%s330_s3] sm:$0xff] }
   0xd   :  { %86 = vmatpush.msra.mxu1 %v71_v10  ;;  %v109_v21 = vld [vmem:[%s332_s5 + $0x38] sm:$0xff]  ;;  %v108_v22 = vld [vmem:[%s332_s5 + $0x30] sm:$0xff]  ;;  %v107_v23 = vld [vmem:[%s332_s5 + $0x28] sm:$0xff] }
   0xe   :  { %126 = vmatpush.msra.mxu2 %v109_v21  ;;  %v106_v24 = vld [vmem:[%s332_s5 + $0x20] sm:$0xff]  ;;  %v105_v25 = vld [vmem:[%s332_s5 + $0x18] sm:$0xff]  ;;  %v104_v30 = vld [vmem:[%s332_s5 + $0x10] sm:$0xff] }
   0xf   :  { %87 = vmatpush.msra.mxu1 %v70_v11  ;;  %v158_v26 = vld [vmem:[%s329_s2] ss:$0 sm:$0xff]  ;;  %v103_v31 = vld [vmem:[%s332_s5 + $0x8] sm:$0xff] }
  0x10   :  { %127 = vmatpush.msra.mxu2 %v108_v22  ;;  %v102_v32 = vld [vmem:[%s332_s5] sm:$0xff]  ;;  %s146_s5 = sshll.u32 %s334_s7, 4  ;;  %s147_s5 = int_to_ptr.hbm [resolvable:$true] %s146_s5 }
  0x11   :  { %88 = vmatpush.msra.mxu1 %v69_v12  ;;  %v159_v33 = vld [vmem:[%s331_s4] ss:$0 sm:$0xff] }
  0x12   :  { %128 = vmatpush.msra.mxu2 %v107_v23  ;;  %v160_v37 = vld [vmem:[%s333_s6] ss:$0 sm:$0xff] }
  0x13   :  { %89 = vmatpush.msra.mxu1 %v68_v13 }
  0x14   :  { %129 = vmatpush.msra.mxu2 %v106_v24 }
  0x15   :  { %90 = vmatpush.msra.mxu1 %v67_v14 }
  0x16   :  { %130 = vmatpush.msra.mxu2 %v105_v25 }
  0x17   :  { %91 = vmatpush.msra.mxu1 %v66_v15 }
  0x18   :  { %131 = vmatpush.msra.mxu2 %v104_v30 }
  0x19   :  { %92 = vmatpush.msra.mxu1 %v65_v16 }
  0x1a   :  { %132 = vmatpush.msra.mxu2 %v103_v31 }
  0x1b   :  { %93 = vmatpush.msra.mxu1 %v64_v17 }
  0x1c   :  { %133 = vmatpush.msra.mxu2 %v102_v32 }
  0x1d   :  { %94 = vmatpush.msra.mxu1 %v63_v18 }
  0x1f   :  { %95 = vmatpush.msra.mxu1 %v62_v19 }
  0x21   :  { %96 = vmatpush.msra.mxu1 %v61_v20 }
  0x86   :  { %v57_v27 = vpop.f32.mrf.mxu0 }
  0x87   :  { %v58_v28 = vadd.f32 %v158_v26, %v57_v27 }
  0x89   :  { %v60_v29 = vmax.f32 %v58_v28, 0.0 }
  0x8b   :  { %97 = vmatmul.f32.vlgmr.msra.gmra.mxu1 %v60_v29 }
 0x108   :  { %v98_v34 = vpop.f32.mrf.mxu1 }
 0x109   :  { %v99_v35 = vadd.f32 %v159_v33, %v98_v34 }
 0x10b   :  { %v101_v36 = vmax.f32 %v99_v35, 0.0 }
 0x10d   :  { %156 = vmatmul.msk.f32.vlgmr.msra.gmra.mxu2 %vm114_vm1, %v101_v36 }
 0x190   :  { %v135_v38 = vpop.f32.mrf.mxu2 }
 0x191   :  { %v136_v39 = vadd.f32 %v160_v37, %v135_v38 }
 0x193   :  { %138 = vst [vmem:[#allocation2] sm:$0xff] %v136_v39 }
 0x194   :  { %149 = dma.vmem_to_hbm [thread:$0]  %s145_s14, 128, %s147_s5, [#allocation3]  }
 0x195   :  { %185 = dma.done.wait [#allocation3], 128  }
 0x196   :  { %186 = vsyncadd [#allocation3], 4294967168 }
 0x197   :  { %154 = vsyncpa [#allocation3], 1 }

</bundles_post_ra>
